<compile_context>
chip_gen: v7x
topology: tpu7x:2x2x1
jax: 0.10.0
libtpu: 0.0.40
codegen_flags: <defaults>
</compile_context>

<pallas_src>
import functools

import numpy as np
import jax
import jax.numpy as jnp
from jax.experimental import pallas as pl
from jax.experimental.pallas import tpu as pltpu

# Fits comfortably under v7x's 64 MiB physical VMEM; v5e/v6e have 128 MiB.
_VMEM_LIMIT = 48 * 1024 * 1024


def _round_up(x, m):
    return (x + m - 1) // m * m


def _row_tile(m, cap):
    """Largest multiple-of-8 divisor of m that is <= cap (m itself if m<=cap).

    Returns 0 if no clean divisor exists (caller pads)."""
    if m <= cap:
        return m
    for t in range(cap - cap % 8, 7, -8):
        if m % t == 0:
            return t
    return 0


# --------------------------- matmul (+bias,+res,+relu) ----------------------

def _mm_kernel(a_ref, b_ref, bias_ref, o_ref, *, relu):
    acc = jnp.dot(a_ref[...], b_ref[...], preferred_element_type=jnp.float32)
    acc = acc + bias_ref[...]
    if relu:
        acc = jnp.maximum(acc, 0.0)
    o_ref[...] = acc.astype(o_ref.dtype)


def _mm_res_kernel(a_ref, b_ref, bias_ref, r_ref, o_ref, *, relu):
    acc = jnp.dot(a_ref[...], b_ref[...], preferred_element_type=jnp.float32)
    acc = acc + bias_ref[...] + r_ref[...].astype(jnp.float32)
    if relu:
        acc = jnp.maximum(acc, 0.0)
    o_ref[...] = acc.astype(o_ref.dtype)


def matmul_bias_act(a, b, bias, relu=False, residual=None,
                    out_dtype=jnp.bfloat16):
    """out = act((M,K)@(K,N) + bias [+ residual]).

    Single full-K block per grid step (K <= 4608 in this network), grid over
    (M tiles, N tiles) only.  bf16 operands, f32 accumulation."""
    M, K = a.shape
    K2, N = b.shape
    assert K == K2 and bias.shape[-1] == N
    a = a.astype(jnp.bfloat16)
    b = b.astype(jnp.bfloat16)
    bias2 = bias.astype(jnp.float32).reshape(1, N)
    if residual is not None:
        residual = residual.astype(jnp.bfloat16)

    cap = 512 if M >= 1024 else 256
    tm = _row_tile(M, cap)
    Mp = M
    if tm == 0:  # ragged M fallback (not hit by ResNet-50 shapes)
        tm = min(cap, _round_up(M, 8))
        Mp = _round_up(M, tm)
        a = jnp.pad(a, ((0, Mp - M), (0, 0)))
        if residual is not None:
            residual = jnp.pad(residual, ((0, Mp - M), (0, 0)))

    if N % 256 == 0:
        tn = 512 if (N % 512 == 0 and M >= 2048) else 256
    else:
        tn = N  # N == 128 (all channel counts are 128-padded)

    # Keep >= 2 grid points on the parallel axes so both v7x TCs get work.
    if (Mp // tm) * (N // tn) == 1 and Mp >= 16 and (Mp // 2) % 8 == 0:
        tm = Mp // 2

    grid = (Mp // tm, N // tn)
    in_specs = [
        pl.BlockSpec((tm, K), lambda i, j: (i, 0)),
        pl.BlockSpec((K, tn), lambda i, j: (0, j)),
        pl.BlockSpec((1, tn), lambda i, j: (0, j)),
    ]
    args = [a, b, bias2]
    if residual is None:
        kernel = functools.partial(_mm_kernel, relu=relu)
    else:
        kernel = functools.partial(_mm_res_kernel, relu=relu)
        in_specs.append(pl.BlockSpec((tm, tn), lambda i, j: (i, j)))
        args.append(residual)

    out = pl.pallas_call(
        kernel,
        out_shape=jax.ShapeDtypeStruct((Mp, N), out_dtype),
        grid=grid,
        in_specs=in_specs,
        out_specs=pl.BlockSpec((tm, tn), lambda i, j: (i, j)),
        compiler_params=pltpu.CompilerParams(
            dimension_semantics=("parallel", "parallel"),
            vmem_limit_bytes=_VMEM_LIMIT),
    )(*args)
    return out[:M] if Mp != M else out


# --------------------------- 3x3 stride-1 conv (no im2col) ------------------

def _conv3x3_kernel(x_ref, w_ref, bias_ref, o_ref, *, relu, Ho, Wo):
    # x_ref: (1, Ho+2, Wo+2, C) spatially padded image; w_ref: (9, C, tn)
    # bias_ref: (1, tn); o_ref: (1, Ho*Wo, tn)
    x = x_ref[0]
    C = x.shape[-1]
    acc = None
    for di in range(3):
        for dj in range(3):
            xs = x[di:di + Ho, dj:dj + Wo, :].reshape(Ho * Wo, C)
            t = jnp.dot(xs, w_ref[di * 3 + dj],
                        preferred_element_type=jnp.float32)
            acc = t if acc is None else acc + t
    acc = acc + bias_ref[...]
    if relu:
        acc = jnp.maximum(acc, 0.0)
    o_ref[0] = acc.astype(o_ref.dtype)


def conv3x3_s1(x, w9, b, relu=True):
    """3x3 / stride 1 conv + folded BN + optional ReLU.

    No HBM im2col: the 9 taps are accumulated inside the kernel from shifted
    in-VMEM slices of the (spatially padded) per-image block."""
    # TODO(synk): for very large images tile H with a halo instead of taking
    # the whole spatial extent per grid step.
    N, H, W, C = x.shape
    cout = w9.shape[-1]
    xp = jnp.pad(x.astype(jnp.bfloat16), ((0, 0), (1, 1), (1, 1), (0, 0)))
    Hp, Wp = H + 2, W + 2
    tn = 256 if cout % 256 == 0 else cout
    bias2 = b.astype(jnp.float32).reshape(1, cout)
    out = pl.pallas_call(
        functools.partial(_conv3x3_kernel, relu=relu, Ho=H, Wo=W),
        out_shape=jax.ShapeDtypeStruct((N, H * W, cout), jnp.bfloat16),
        grid=(N, cout // tn),
        in_specs=[
            pl.BlockSpec((1, Hp, Wp, C), lambda n, j: (n, 0, 0, 0)),
            pl.BlockSpec((9, C, tn), lambda n, j: (0, 0, j)),
            pl.BlockSpec((1, tn), lambda n, j: (0, j)),
        ],
        out_specs=pl.BlockSpec((1, H * W, tn), lambda n, j: (n, 0, j)),
        compiler_params=pltpu.CompilerParams(
            dimension_semantics=("parallel", "parallel"),
            vmem_limit_bytes=_VMEM_LIMIT),
    )(xp, w9.astype(jnp.bfloat16), bias2)
    return out.reshape(N, H, W, cout)


# --------------------------- 1x1 conv / patch-conv fallback -----------------

def conv1x1(x, w, b, stride=1, relu=True, residual=None):
    """1x1 conv + folded BN (+ fused residual add) + optional ReLU."""
    N, H, W, C = x.shape
    if stride > 1:
        x = x[:, ::stride, ::stride, :]
        H, W = x.shape[1], x.shape[2]
    cout = w.shape[-1]
    cols = x.reshape(N * H * W, C)
    res = residual.reshape(N * H * W, cout) if residual is not None else None
    out = matmul_bias_act(cols, w, b, relu=relu, residual=res)
    return out.reshape(N, H, W, cout)


def _extract_patches(x, k, stride, pad):
    """x: [N,H,W,C] -> (N,Ho,Wo,k*k,C): taps on 2nd-to-last axis so the flatten
    to (M, k*k*C) is layout-free."""
    N, H, W, C = x.shape
    if pad > 0:
        x = jnp.pad(x, ((0, 0), (pad, pad), (pad, pad), (0, 0)))
    Hp, Wp = H + 2 * pad, W + 2 * pad
    Ho = (Hp - k) // stride + 1
    Wo = (Wp - k) // stride + 1
    cols = []
    for i in range(k):
        for j in range(k):
            cols.append(x[:, i:i + (Ho - 1) * stride + 1:stride,
                          j:j + (Wo - 1) * stride + 1:stride, :])
    return jnp.stack(cols, axis=3), Ho, Wo


def conv_patches(x, w, b, k, stride, pad, relu, k_pad_to=None):
    """k x k conv via tap-stacked patches + full-K matmul.  Only used for the
    7x7 stem and the three stride-2 3x3 convs (small tensors)."""
    # TODO(synk): the stride-2 convs could also use a parity-plane split (like
    # maxpool below) to avoid the k*k activation duplication entirely.
    N, H, W, C = x.shape
    cout = w.shape[-1]
    patches, Ho, Wo = _extract_patches(x.astype(jnp.bfloat16), k, stride, pad)
    cols = patches.reshape(N * Ho * Wo, k * k * C)
    if k_pad_to is not None and k_pad_to > cols.shape[1]:
        cols = jnp.pad(cols, ((0, 0), (0, k_pad_to - cols.shape[1])))
    out = matmul_bias_act(cols, w, b, relu=relu)
    return out.reshape(N, Ho, Wo, cout)


# --------------------------- maxpool 3x3 / stride 2 -------------------------

def _maxpool_kernel(ee_ref, eo_ref, oe_ref, oo_ref, o_ref, *, Ho, Wo):
    ee = ee_ref[0]
    eo = eo_ref[0]
    oe = oe_ref[0]
    oo = oo_ref[0]
    m = ee[0:Ho, 0:Wo]
    m = jnp.maximum(m, ee[0:Ho, 1:Wo + 1])
    m = jnp.maximum(m, ee[1:Ho + 1, 0:Wo])
    m = jnp.maximum(m, ee[1:Ho + 1, 1:Wo + 1])
    m = jnp.maximum(m, eo[0:Ho, 0:Wo])
    m = jnp.maximum(m, eo[1:Ho + 1, 0:Wo])
    m = jnp.maximum(m, oe[0:Ho, 0:Wo])
    m = jnp.maximum(m, oe[0:Ho, 1:Wo + 1])
    m = jnp.maximum(m, oo[0:Ho, 0:Wo])
    o_ref[0] = m.astype(o_ref.dtype)


def maxpool_3x3_s2(x):
    """MaxPool(3, stride=2, pad=1) via 4 parity planes (~1x HBM traffic) and
    9 contiguous in-VMEM shifted slices."""
    N, H, W, C = x.shape
    assert H % 2 == 0 and W % 2 == 0
    Ho, Wo = H // 2, W // 2
    xp = jnp.pad(x, ((0, 0), (1, 1), (1, 1), (0, 0)),
                 constant_values=-jnp.inf)
    ee = xp[:, 0::2, 0::2, :]
    eo = xp[:, 0::2, 1::2, :]
    oe = xp[:, 1::2, 0::2, :]
    oo = xp[:, 1::2, 1::2, :]   # each (N, Ho+1, Wo+1, C)
    in_specs = [pl.BlockSpec((1, Ho + 1, Wo + 1, C), lambda n: (n, 0, 0, 0))
                for _ in range(4)]
    out = pl.pallas_call(
        functools.partial(_maxpool_kernel, Ho=Ho, Wo=Wo),
        out_shape=jax.ShapeDtypeStruct((N, Ho, Wo, C), x.dtype),
        grid=(N,),
        in_specs=in_specs,
        out_specs=pl.BlockSpec((1, Ho, Wo, C), lambda n: (n, 0, 0, 0)),
        compiler_params=pltpu.CompilerParams(
            dimension_semantics=("parallel",),
            vmem_limit_bytes=_VMEM_LIMIT),
    )(ee, eo, oe, oo)
    return out


# --------------------------- global average pool ----------------------------

def _mean_kernel(x_ref, o_ref):
    o_ref[...] = jnp.mean(x_ref[...].astype(jnp.float32), axis=1,
                          keepdims=True)


def global_avg_pool(x):
    N, H, W, C = x.shape
    xr = x.reshape(N, H * W, C)
    out = pl.pallas_call(
        _mean_kernel,
        out_shape=jax.ShapeDtypeStruct((N, 1, C), jnp.float32),
        grid=(N,),
        in_specs=[pl.BlockSpec((1, H * W, C), lambda n: (n, 0, 0))],
        out_specs=pl.BlockSpec((1, 1, C), lambda n: (n, 0, 0)),
        compiler_params=pltpu.CompilerParams(
            dimension_semantics=("parallel",)),
    )(xr)
    return out.reshape(N, C)


# --------------------------------- parameters -------------------------------

def _conv_bn_params(key, cin_real, cin_pad, cout_real, k, k_rows_pad=None,
                    as_taps=False):
    """Conv weight as [k*k*cin_pad, cout_pad] (or [k*k, cin_pad, cout_pad] when
    as_taps) in bf16; zero rows/columns for padded channels so padded lanes
    stay identically zero through the network.  BN(eval) folded (gamma=1,
    var=1, mean=0 -> scale 1, beta becomes the bias)."""
    cout_pad = _round_up(cout_real, 128)
    kw_, kb = jax.random.split(key)
    fan_in = cin_real * k * k
    w_real = jax.random.normal(kw_, (k, k, cin_real, cout_real),
                               jnp.float32) * np.sqrt(2.0 / fan_in)
    w = jnp.zeros((k, k, cin_pad, cout_pad), jnp.float32)
    w = w.at[:, :, :cin_real, :cout_real].set(w_real)
    w = w.reshape(k * k * cin_pad, cout_pad)
    if k_rows_pad is not None and k_rows_pad > w.shape[0]:
        w = jnp.pad(w, ((0, k_rows_pad - w.shape[0]), (0, 0)))
    if as_taps:
        w = w.reshape(k * k, cin_pad, cout_pad)
    beta = jax.random.normal(kb, (cout_real,), jnp.float32) * 0.01
    b = jnp.zeros((cout_pad,), jnp.float32).at[:cout_real].set(beta)
    return w.astype(jnp.bfloat16), b


def init_encoder_params(key, embed_size):
    keys = iter(jax.random.split(key, 64))
    params = {
        'embed_size': embed_size,
        # stem: contraction dim 7*7*3 = 147 padded up to 256 (lane aligned)
        'conv1': _conv_bn_params(next(keys), 3, 3, 64, 7, k_rows_pad=256),
    }
    # ResNet-50 bottleneck config: (width, out_ch, num_blocks, first_stride)
    cfg = [(64, 256, 3, 1), (128, 512, 4, 2), (256, 1024, 6, 2),
           (512, 2048, 3, 2)]
    blocks = []
    in_real, in_pad = 64, 128
    for width, out_ch, nblocks, stride in cfg:
        w_pad = _round_up(width, 128)
        for bi in range(nblocks):
            s = stride if bi == 0 else 1
            blk = {
                'conv1': _conv_bn_params(next(keys), in_real, in_pad, width, 1),
                'conv2': _conv_bn_params(next(keys), width, w_pad, width, 3,
                                         as_taps=True),
                'conv3': _conv_bn_params(next(keys), width, w_pad, out_ch, 1),
                'stride': s,
            }
            if bi == 0:
                blk['down'] = _conv_bn_params(next(keys), in_real, in_pad,
                                              out_ch, 1)
            blocks.append(blk)
            in_real, in_pad = out_ch, _round_up(out_ch, 128)
    params['blocks'] = blocks
    # embed Linear, padded to a multiple of 128 output lanes (sliced after)
    kw_, kb = jax.random.split(next(keys))
    e_pad = _round_up(embed_size, 128)
    bound = 1.0 / np.sqrt(2048.0)
    w_real = jax.random.uniform(kw_, (2048, embed_size), jnp.float32,
                                -bound, bound)
    b_real = jax.random.uniform(kb, (embed_size,), jnp.float32, -bound, bound)
    params['embed_w'] = (jnp.zeros((2048, e_pad), jnp.float32)
                         .at[:, :embed_size].set(w_real).astype(jnp.bfloat16))
    params['embed_b'] = (jnp.zeros((e_pad,), jnp.float32)
                         .at[:embed_size].set(b_real))
    return params


# --------------------------------- forward ----------------------------------

def encoder_cnn_forward(images_nchw, params):
    """images_nchw: [N, 3, H, W] (PyTorch convention) -> [N, embed_size]."""
    x = jnp.transpose(images_nchw, (0, 2, 3, 1)).astype(jnp.bfloat16)  # NHWC
    w, b = params['conv1']
    x = conv_patches(x, w, b, k=7, stride=2, pad=3, relu=True,
                     k_pad_to=w.shape[0])
    x = maxpool_3x3_s2(x)
    for blk in params['blocks']:
        s = blk['stride']
        if 'down' in blk:
            identity = conv1x1(x, *blk['down'], stride=s, relu=False)
        else:
            identity = x
        out = conv1x1(x, *blk['conv1'], stride=1, relu=True)
        w2, b2 = blk['conv2']
        if s == 1:
            out = conv3x3_s1(out, w2, b2, relu=True)
        else:
            out = conv_patches(out, w2.reshape(-1, w2.shape[-1]), b2,
                               k=3, stride=s, pad=1, relu=True)
        # conv3 with fused residual add + ReLU (out = relu(conv3(out)+identity))
        x = conv1x1(out, *blk['conv3'], stride=1, relu=True, residual=identity)
    feats = global_avg_pool(x)                      # [N, 2048]
    emb = matmul_bias_act(feats, params['embed_w'], params['embed_b'],
                          relu=False, out_dtype=jnp.float32)
    return emb[:, :params['embed_size']]


if __name__ == "__main__":
    key = jax.random.PRNGKey(0)
    k_img, k_par = jax.random.split(key)
    embed_size = 128
    # Small NCHW images (batch=2, 3 channels, 64x64) -> 2x2 spatial pre-avgpool.
    images = jax.random.normal(k_img, (2, 3, 64, 64), jnp.float32)
    params = init_encoder_params(k_par, embed_size)

    feats = encoder_cnn_forward(images, params)
    feats = jax.block_until_ready(feats)

    assert feats.shape == (2, embed_size), feats.shape
    assert bool(jnp.all(jnp.isfinite(feats)))
    print("KERNEL_OK")
</pallas_src>

<mosaic_0001>
module attributes {stable_mosaic.version = 11 : i64} {
  func.func @_mm_kernel(%arg0: i32, %arg1: i32, %arg2: memref<512x256xbf16, #tpu.memory_space<vmem>>, %arg3: memref<256x128xbf16, #tpu.memory_space<vmem>>, %arg4: memref<1x128xf32, #tpu.memory_space<vmem>>, %arg5: memref<512x128xbf16, #tpu.memory_space<vmem>>) attributes {dimension_semantics = [#tpu.dimension_semantics<parallel>, #tpu.dimension_semantics<parallel>], iteration_bounds = array<i64: 4, 1>, scalar_prefetch = 0 : i64, scratch_operands = 0 : i64, tpu.core_type = #tpu.core_type<tc>, window_params = [{transform_indices = @transform_0, window_bounds = array<i64: 512, 256>}, {transform_indices = @transform_1, window_bounds = array<i64: 256, 128>}, {transform_indices = @transform_2, window_bounds = array<i64: 1, 128>}, {transform_indices = @transform_3, window_bounds = array<i64: 512, 128>}]} {
    %c0 = arith.constant 0 : index
    %c0_0 = arith.constant 0 : index
    %0 = vector.load %arg2[%c0, %c0_0] : memref<512x256xbf16, #tpu.memory_space<vmem>>, vector<512x256xbf16>
    %c0_1 = arith.constant 0 : index
    %c0_2 = arith.constant 0 : index
    %1 = vector.load %arg3[%c0_1, %c0_2] : memref<256x128xbf16, #tpu.memory_space<vmem>>, vector<256x128xbf16>
    %cst = arith.constant dense<0.000000e+00> : vector<512x128xf32>
    %2 = tpu.matmul %0, %1, %cst {dimension_numbers = #tpu.dot_dimension_numbers<[1], [0], [0], [1], [0, 0, 1, 1], [], []>} : vector<512x256xbf16>, vector<256x128xbf16>, vector<512x128xf32> -> vector<512x128xf32>
    %c0_3 = arith.constant 0 : index
    %c0_4 = arith.constant 0 : index
    %3 = vector.load %arg4[%c0_3, %c0_4] : memref<1x128xf32, #tpu.memory_space<vmem>>, vector<1x128xf32>
    %4 = vector.broadcast %3 : vector<1x128xf32> to vector<512x128xf32>
    %5 = arith.addf %2, %4 : vector<512x128xf32>
    %cst_5 = arith.constant 0.000000e+00 : f32
    %6 = vector.broadcast %cst_5 : f32 to vector<512x128xf32>
    %7 = arith.maximumf %5, %6 : vector<512x128xf32>
    %8 = arith.truncf %7 : vector<512x128xf32> to vector<512x128xbf16>
    %c0_6 = arith.constant 0 : index
    %c0_7 = arith.constant 0 : index
    %9 = vector.load %arg5[%c0_6, %c0_7] : memref<512x128xbf16, #tpu.memory_space<vmem>>, vector<512x128xbf16>
    tpu.vector_store %arg5[%c0_6, %c0_7], %8 {strides = array<i32>} : memref<512x128xbf16, #tpu.memory_space<vmem>>, vector<512x128xbf16>,
    return
  }
  func.func @transform_0(%arg0: i32, %arg1: i32) -> (i32, i32) {
    %c0_i32 = arith.constant 0 : i32
    %c0_i32_0 = arith.constant 0 : i32
    return %arg0, %c0_i32 : i32, i32
  }
  func.func @transform_1(%arg0: i32, %arg1: i32) -> (i32, i32) {
    %c0_i32 = arith.constant 0 : i32
    %c0_i32_0 = arith.constant 0 : i32
    return %c0_i32, %arg1 : i32, i32
  }
  func.func @transform_2(%arg0: i32, %arg1: i32) -> (i32, i32) {
    %c0_i32 = arith.constant 0 : i32
    %c0_i32_0 = arith.constant 0 : i32
    return %c0_i32, %arg1 : i32, i32
  }
  func.func @transform_3(%arg0: i32, %arg1: i32) -> (i32, i32) {
    %c0_i32 = arith.constant 0 : i32
    return %arg0, %arg1 : i32, i32
  }
}

</mosaic_0001>

<bundles_post_ra>
// kernel: tpu_custom_call.1
= control target key start
LH: loop header
LB: loop body
LE: loop exit
PB: predicated region body
PF: predicated region fallthrough
CT: control target
= control target key end

     0   :  { %8 = vsyncpa [#allocation3], 0  ;;  %s2799_s0 = inlined_call_operand.hbm [shape: bf16[2048,256], index: 0, kind: input, shape index: {}]   ;;  %s2800_s1 = inlined_call_operand.hbm [shape: bf16[256,128], index: 1, kind: input, shape index: {}]   ;;  %s2801_s2 = inlined_call_operand.vmem [shape: f32[1,128], index: 2, kind: input, shape index: {}]   ;;  %s2802_s3 = inlined_call_operand.hbm [shape: bf16[2048,128], index: 3, kind: output, shape index: {}]  }
   0x1   :  { %10 = vsyncpa [#allocation3 + $0x1], 0 }
   0x2   :  { %11 = vsyncpa [#allocation6], 0 }
   0x3   :  { %12 = vsyncpa [#allocation4], 0 }
   0x4   :  { %14 = vsyncpa [#allocation4 + $0x1], 0  ;;  %s2379_s12 = smov 0   ;;  %s2381_s13 = smov 0  }
   0x5   :  { %s2383_s14 = smov 0   ;;  %s2385_s15 = smov 0  }
   0x6   :  { %s2387_s16 = smov 0   ;;  %s2389_s17 = smov 0  }
   0x7 LB: > { %s1557_s18 = sadd.s32 4294967295, %s2347_s17   ;;  %s1558_s19 = sadd.s32 4294967294, %s2347_s17   ;;  %s2347_s17 = sphi %s2389_s17, %s20_s17   ;;  %s2343_s16 = sphi %s2387_s16, %s2825_s16   ;;  %s2339_s15 = sphi %s2385_s15, %s2824_s15   ;;  %s2335_s14 = sphi %s2383_s14, %s2823_s14   ;;  %s2331_s13 = sphi %s2381_s13, %s2822_s13   ;;  %s2327_s12 = sphi %s2379_s12, %s2821_s12  }
   0x8   : > { %p52_p0 = scmp.ne.s32.totalorder %s2331_s13, %s2327_s12  ;;  %p2413_p1 = scmp.eq.s32.totalorder %s1557_s18, 0 }
   0x9   : > { %p2417_p2 = scmp.eq.s32.totalorder %s1557_s18, 3  ;;  %p136_p3 = scmp.eq.s32.totalorder %s1558_s19, 3 }
   0xa   : > { %s2807_s20 = scalar_select %p2413_p1, 1, 0 }
   0xb   : > { %s2808_s21 = scalar_select %p2417_p2, 1, 0 }
   0xc   : > { %p2423_p4 = por %p2413_p1, %p52_p0  ;;  %p1559_p5 = scmp.ge.s32.totalorder %s2347_s17, 1 }
   0xd   : > { %p2428_p6 = por %p136_p3, %p52_p0  ;;  %p143_p7 = scmp.lt.s32.totalorder %s2347_s17, 5 }
   0xe   : > { %s2809_s22 = scalar_select %p2423_p4, 1, 0 }
   0xf   : > { %s2810_s23 = scalar_select %p2428_p6, 1, 0 }
  0x10   : > { %p2433_p8 = pnand %p1559_p5, %p143_p7  ;;  %s2349_s25 = smov [#allocation5]  }
  0x11   : > { %s157_s26 = sshll.u32 %s2349_s25, 4  ;;  %s32_s28 = sadd.s32 1, %s2343_s16  ;;  %s158_s26 = int_to_ptr.vmem [resolvable:$true] %s157_s26 }
  0x12   : > { %s2811_s24 = scalar_select %p2433_p8, 1, 0 }
  0x13   : > { %p2019_p9 = pneg %p2433_p8  ;;  %s2203_s4 = scalar_lea.hbm %s2800_s1, 2048 }
  0x14   : > { %p2204_p11 = scmp.ne.s32.totalorder %s2800_s1, %s2203_s4  ;;  %p2210_p3 = scmp.lt.u32.totalorder %s2203_s4, %s2800_s1 }
  0x15   : > { %p2441_p10 = pnand %p2019_p9, %p2413_p1 }
  0x17   : > { %p2205_p12 = pneg %p2441_p10 }
  0x19   : > { %p2206_p13 = pnand %p2205_p12, %p2204_p11 }
  0x1b   : > { %p2207_p0 = pneg %p2206_p13 }
  0x1d   : > { %p2212_p5 = pnand %p2210_p3, %p2207_p0 }
  0x1f   : > { %2215 = shalt.err (!%p2212_p5)
}
  0x20   : > { %s2216_s9 = scalar_lea.vmem %s158_s26, 2048  ;;  %p2224_p1 = scmp.lt.s32.totalorder %s158_s26, %s158_s26 }
  0x21   : > { %p2217_p7 = scmp.ne.s32.totalorder %s158_s26, %s2216_s9  ;;  %p2225_p4 = scmp.lt.s32.totalorder %s2216_s9, %s2216_s9 }
  0x23   : > { %p2219_p9 = pnand %p2217_p7, %p2205_p12  ;;  %p2226_p8 = por %p2225_p4, %p2224_p1 }
  0x25   : > { %p2220_p6 = pneg %p2219_p9 }
  0x27   : > { %p2227_p2 = pnand %p2226_p8, %p2220_p6 }
  0x29   : > { %2230 = shalt.err (!%p2227_p2)
}
  0x2a   : > { %s2350_s10 = smov 64   ;;  %s2351_s11 = smov 4  }
  0x2b   : > { %2022 = dma.hbm_to_vmem [thread:$0]  (!%p2441_p10), %s2800_s1, 2048, %s158_s26, [#allocation6], %s2350_s10, %s2350_s10, %s2351_s11  }
  0x2c   : > { %p34_p1 = scmp.ge.s32.totalorder %s32_s28, 4  ;;  %s39_s25 = sadd.s32 1, %s2335_s14 }
  0x2d   : > { %p46_p2 = scmp.ne.s32.totalorder %s2335_s14, %s2331_s13  ;;  %p47_p4 = scmp.eq.s32.totalorder %s2347_s17, 0 }
  0x2e   : > { %s2827_s28 = smov (%p34_p1, %s32_s28), 0  ;;  %p2814_p8 = scmp.ne.s32.totalorder %s2808_s21, 0 }
  0x2f   : > { %p2468_p6 = por %p47_p4, %p46_p2  ;;  %s36_s27 = ssub.s32 %s2343_s16, %s2827_s28 }
  0x30   : > { %p2474_p11 = por %p2814_p8, %p46_p2  ;;  %p2032_p12 = scmp.lt.s32.totalorder %s2347_s17, 4 }
  0x31   : > { %p37_p10 = scmp.eq.s32.totalorder %s36_s27, 0  ;;  %s177_s26 = sand.u32 1, %s2335_s14  }
  0x32   : > { %s1563_s4 = sshll.u32 %s177_s26, 9  ;;  %s1722_s6 = sshll.u32 %s2343_s16, 13 }
  0x33   : > { %s2483_s5 = scalar_select %p37_p10, %s2335_s14, %s39_s25  }
  0x34   : > { %s2489_s9 = scalar_lea.hbm %s2799_s0, %s1722_s6  ;;  %s181_s21 = scalar_lea.vmem [#allocation2], %s1563_s4 }
  0x35   : > { %s189_s10 = sshll.u32 %s181_s21, 4  ;;  %p2495_p13 = pnand %p2032_p12, %p2468_p6  ;;  %s2491_s10 = int_to_ptr.vmem [resolvable:$true] %s189_s10 }
  0x36   : > { %s2499_s18 = scalar_lea.sflag [#allocation3], %s177_s26  ;;  %s2231_s19 = scalar_lea.hbm %s2489_s9, 8192 }
  0x37   : > { %p2232_p0 = scmp.ne.s32.totalorder %s2489_s9, %s2231_s19  ;;  %p2233_p3 = pneg %p2495_p13 }
  0x38   : > { %s2236_s29 = scalar_lea.hbm %s2799_s0, 32768  ;;  %p2237_p9 = scmp.lt.u32.totalorder %s2489_s9, %s2799_s0 }
  0x39   : > { %p2234_p5 = pnand %p2233_p3, %p2232_p0  ;;  %p2238_p1 = scmp.lt.u32.totalorder %s2236_s29, %s2231_s19 }
  0x3a   : > { %p2240_p4 = scmp.lt.u32.totalorder %s2231_s19, %s2489_s9 }
  0x3b   : > { %p2235_p7 = pneg %p2234_p5  ;;  %p2239_p2 = por %p2238_p1, %p2237_p9 }
  0x3d   : > { %p2241_p6 = por %p2240_p4, %p2239_p2 }
  0x3f   : > { %p2242_p8 = pnand %p2241_p6, %p2235_p7 }
  0x41   : > { %2245 = shalt.err (!%p2242_p8)
}
  0x42   : > { %s2246_s26 = scalar_lea.vmem %s2491_s10, 8192  ;;  %s2352_s7 = smov [#allocation2]  }
  0x43   : > { %p2247_p12 = scmp.ne.s32.totalorder %s2491_s10, %s2246_s26  ;;  %s2251_s8 = sshll.u32 %s2352_s7, 4  ;;  %s2252_s8 = int_to_ptr.vmem [resolvable:$false] %s2251_s8 }
  0x44   : > { %s2253_s21 = scalar_lea.vmem %s2252_s8, 16384  ;;  %p2254_p5 = scmp.lt.s32.totalorder %s2491_s10, %s2252_s8 }
  0x45   : > { %p2249_p10 = pnand %p2247_p12, %p2233_p3  ;;  %p2255_p9 = scmp.lt.s32.totalorder %s2253_s21, %s2246_s26 }
  0x47   : > { %p2250_p0 = pneg %p2249_p10  ;;  %p2256_p1 = por %p2255_p9, %p2254_p5 }
  0x49   : > { %p2257_p2 = pnand %p2256_p1, %p2250_p0 }
  0x4b   : > { %2260 = shalt.err (!%p2257_p2)
}
  0x4c   : > { %s2353_s19 = smov 128   ;;  %s2354_s25 = smov 8  }
  0x4d   : > { %2026 = dma.hbm_to_vmem [thread:$0]  (!%p2495_p13), %s2489_s9, 8192, %s2491_s10, %s2499_s18, %s2353_s19, %s2353_s19, %s2354_s25  }
  0x4e   : > { %p2817_p3 = scmp.ne.s32.totalorder %s2811_s24, 0 }
  0x4f   : > { %s2530_s27 = sand.u32 (!%p2817_p3), 1, %s2331_s13   ;;  %p2818_p7 = scmp.ne.s32.totalorder (!%p2817_p3), %s2809_s22, 0 }
  0x50   : > { %201 = sbr.rel (%p2817_p3) target bundleno = 511 (0x1ff), region = 32  ;;  %s1568_s29 = sshll.u32 (!%p2817_p3), %s2530_s27, 9 }
  0x51   : > { %s204_s4 = scalar_lea.sflag (!%p2817_p3), [#allocation3], %s2530_s27  ;;  %s2534_s6 = scalar_lea.vmem (!%p2817_p3), [#allocation2], %s1568_s29 }
  0x57   : > { %2314 = dma.done.wait (%p2818_p7), %s204_s4, 8192  }
  0x58   : > { %2316 = vsyncadd (%p2818_p7), %s204_s4, 4294959104  ;;  %p2819_p13 = scmp.ne.s32.totalorder %s2807_s20, 0 }
  0x5a   : > { %2318 = dma.done.wait (%p2819_p13), [#allocation6], 2048  }
  0x5b   : > { %2320 = vsyncadd (%p2819_p13), [#allocation6], 4294965248  ;;  %v2355_v0 = vmov 0   ;;  %v2091_v1 = vld [vmem:[#allocation5] sm:$0xff]   ;;  %v2092_v2 = vld [vmem:[#allocation5 + $0x8] sm:$0xff]   ;;  %s1570_s24 = sshll.u32 %s2530_s27, 8 }
  0x5c   : > { %762 = vmatprep.subr.bf16.mxu0 %v2355_v0  ;;  %1979 = vmatprep.subr.bf16.mxu1 %v2355_v0  ;;  %v2093_v3 = vld [vmem:[#allocation5 + $0x10] sm:$0xff]   ;;  %v2094_v4 = vld [vmem:[#allocation5 + $0x18] sm:$0xff]   ;;  %v2095_v5 = vld [vmem:[#allocation5 + $0x20] sm:$0xff]   ;;  %s2650_s9 = scalar_lea.vmem [#allocation7], %s1570_s24  ;;  %s1787_s10 = sshll.u32 %s2339_s15, 12 }
  0x5d   : > { %763 = vmatpush1.bf16.msra.mxu0 %v2091_v1  ;;  %1995 = vmatpush1.bf16.msra.mxu1 %v2091_v1  ;;  %v2109_v6 = vld [vmem:[%s2534_s6 + $0x4] ss:$8 sps:$4 sm:$0xff]   ;;  %v2097_v9 = vld [vmem:[#allocation5 + $0x30] sm:$0xff]   ;;  %v2098_v10 = vld [vmem:[#allocation5 + $0x38] sm:$0xff]   ;;  %s1450_s11 = sshll.u32 %s2650_s9, 4  ;;  %s2747_s7 = scalar_lea.hbm %s2802_s3, %s1787_s10  ;;  %s2749_s11 = int_to_ptr.vmem [resolvable:$true] %s1450_s11 }
  0x5e   : > { %764 = vmatprep.subr.bf16.mxu0 %v2355_v0  ;;  %1980 = vmatprep.subr.bf16.mxu1 %v2355_v0  ;;  %v2096_v7 = vld [vmem:[#allocation5 + $0x28] sm:$0xff]   ;;  %v2099_v11 = vld [vmem:[#allocation5 + $0x40] sm:$0xff]   ;;  %v2101_v13 = vld [vmem:[#allocation5 + $0x50] sm:$0xff]   ;;  %s1436_s15 = scalar_lea.sflag [#allocation4], %s2530_s27  ;;  %s2261_s8 = scalar_lea.vmem %s2749_s11, 4096 }
  0x5f   : > { %v2112_v8 = vld [vmem:[%s2534_s6 + $0x104] ss:$8 sps:$4 sm:$0xff]   ;;  %794 = vmatprep.mubr.bf16.mxu0 %v2109_v6  ;;  %v2102_v14 = vld [vmem:[#allocation5 + $0x58] sm:$0xff]   ;;  %v2105_v17 = vld [vmem:[#allocation5 + $0x70] sm:$0xff]   ;;  %p2262_p4 = scmp.ne.s32.totalorder %s2749_s11, %s2261_s8  ;;  %s2356_s21 = smov [#allocation7]  }
  0x60   : > { %922 = vmatprep.mubr.bf16.mxu1 %v2112_v8  ;;  %v2100_v12 = vld [vmem:[#allocation5 + $0x48] sm:$0xff]   ;;  %v2103_v15 = vld [vmem:[#allocation5 + $0x60] sm:$0xff]   ;;  %v2106_v18 = vld [vmem:[#allocation5 + $0x78] sm:$0xff]   ;;  %s2265_s19 = sshll.u32 %s2356_s21, 4  ;;  %s2266_s19 = int_to_ptr.vmem [resolvable:$false] %s2265_s19 }
  0x61   : > { %765 = vmatpush1.bf16.msra.mxu0 %v2092_v2  ;;  %1996 = vmatpush1.bf16.msra.mxu1 %v2092_v2  ;;  %v2104_v16 = vld [vmem:[#allocation5 + $0x68] sm:$0xff]   ;;  %v2113_v21 = vld [vmem:[%s2534_s6 + $0x14] ss:$8 sps:$4 sm:$0xff]   ;;  %v2117_v23 = vld [vmem:[%s2534_s6 + $0x10] ss:$8 sps:$4 sm:$0xff]   ;;  %p2263_p6 = pnand %p2262_p4, %p2474_p11  ;;  %s2267_s25 = scalar_lea.vmem %s2266_s19, 8192 }
  0x62   : > { %766 = vmatprep.subr.bf16.mxu0 %v2355_v0  ;;  %1981 = vmatprep.subr.bf16.mxu1 %v2355_v0  ;;  %v2107_v19 = vld [vmem:[%s2534_s6] ss:$8 sps:$4 sm:$0xff]   ;;  %v2115_v22 = vld [vmem:[%s2534_s6 + $0x114] ss:$8 sps:$4 sm:$0xff]   ;;  %v2118_v24 = vld [vmem:[%s2534_s6 + $0x110] ss:$8 sps:$4 sm:$0xff]   ;;  %p2268_p12 = scmp.lt.s32.totalorder %s2749_s11, %s2266_s19  ;;  %p2269_p10 = scmp.lt.s32.totalorder %s2267_s25, %s2261_s8 }
  0x63   : > { %v2110_v20 = vld [vmem:[%s2534_s6 + $0x100] ss:$8 sps:$4 sm:$0xff]   ;;  %v2119_v25 = vld [vmem:[%s2534_s6 + $0x24] ss:$8 sps:$4 sm:$0xff]   ;;  %v2125_v29 = vld [vmem:[%s2534_s6 + $0x34] ss:$8 sps:$4 sm:$0xff]   ;;  %p2264_p8 = pneg %p2263_p6 }
  0x64   : > { %v2121_v26 = vld [vmem:[%s2534_s6 + $0x124] ss:$8 sps:$4 sm:$0xff]   ;;  %v2123_v27 = vld [vmem:[%s2534_s6 + $0x20] ss:$8 sps:$4 sm:$0xff]   ;;  %v2127_v30 = vld [vmem:[%s2534_s6 + $0x134] ss:$8 sps:$4 sm:$0xff]   ;;  %p2270_p0 = por %p2269_p10, %p2268_p12 }
  0x65   : > { %767 = vmatpush1.bf16.msra.mxu0 %v2093_v3  ;;  %1997 = vmatpush1.bf16.msra.mxu1 %v2093_v3  ;;  %v2124_v28 = vld [vmem:[%s2534_s6 + $0x120] ss:$8 sps:$4 sm:$0xff]   ;;  %v2129_v31 = vld [vmem:[%s2534_s6 + $0x30] ss:$8 sps:$4 sm:$0xff]   ;;  %v2131_v33 = vld [vmem:[%s2534_s6 + $0x44] ss:$8 sps:$4 sm:$0xff]  }
  0x66   : > { %768 = vmatprep.subr.bf16.mxu0 %v2355_v0  ;;  %1982 = vmatprep.subr.bf16.mxu1 %v2355_v0  ;;  %v2130_v32 = vld [vmem:[%s2534_s6 + $0x130] ss:$8 sps:$4 sm:$0xff]   ;;  %v2133_v34 = vld [vmem:[%s2534_s6 + $0x144] ss:$8 sps:$4 sm:$0xff]   ;;  %v2135_v35 = vld [vmem:[%s2534_s6 + $0x40] ss:$8 sps:$4 sm:$0xff]   ;;  %p2271_p5 = pnand %p2270_p0, %p2264_p8 }
  0x67   : > { %v2136_v36 = vld [vmem:[%s2534_s6 + $0x140] ss:$8 sps:$4 sm:$0xff]   ;;  %v2137_v37 = vld [vmem:[%s2534_s6 + $0x54] ss:$8 sps:$4 sm:$0xff]   ;;  %v2141_v39 = vld [vmem:[%s2534_s6 + $0x50] ss:$8 sps:$4 sm:$0xff]  }
  0x68   : > { %v2139_v38 = vld [vmem:[%s2534_s6 + $0x154] ss:$8 sps:$4 sm:$0xff]   ;;  %v2142_v40 = vld [vmem:[%s2534_s6 + $0x150] ss:$8 sps:$4 sm:$0xff]   ;;  %v2143_v41 = vld [vmem:[%s2534_s6 + $0x64] ss:$8 sps:$4 sm:$0xff]  }
  0x69   : > { %769 = vmatpush1.bf16.msra.mxu0 %v2094_v4  ;;  %1998 = vmatpush1.bf16.msra.mxu1 %v2094_v4  ;;  %v2145_v42 = vld [vmem:[%s2534_s6 + $0x164] ss:$8 sps:$4 sm:$0xff]   ;;  %v2147_v43 = vld [vmem:[%s2534_s6 + $0x60] ss:$8 sps:$4 sm:$0xff]   ;;  %v2149_v45 = vld [vmem:[%s2534_s6 + $0x74] ss:$8 sps:$4 sm:$0xff]  }
  0x6a   : > { %770 = vmatprep.subr.bf16.mxu0 %v2355_v0  ;;  %1983 = vmatprep.subr.bf16.mxu1 %v2355_v0  ;;  %v2148_v44 = vld [vmem:[%s2534_s6 + $0x160] ss:$8 sps:$4 sm:$0xff]   ;;  %v2151_v46 = vld [vmem:[%s2534_s6 + $0x174] ss:$8 sps:$4 sm:$0xff]   ;;  %v2153_v47 = vld [vmem:[%s2534_s6 + $0x70] ss:$8 sps:$4 sm:$0xff]  }
  0x6b   : > { %v2154_v48 = vld [vmem:[%s2534_s6 + $0x170] ss:$8 sps:$4 sm:$0xff]   ;;  %v2155_v49 = vld [vmem:[%s2534_s6 + $0x84] ss:$8 sps:$4 sm:$0xff]   ;;  %v2159_v51 = vld [vmem:[%s2534_s6 + $0x80] ss:$8 sps:$4 sm:$0xff]  }
  0x6c   : > { %v2157_v50 = vld [vmem:[%s2534_s6 + $0x184] ss:$8 sps:$4 sm:$0xff]   ;;  %v2160_v52 = vld [vmem:[%s2534_s6 + $0x180] ss:$8 sps:$4 sm:$0xff]   ;;  %v2161_v53 = vld [vmem:[%s2534_s6 + $0x94] ss:$8 sps:$4 sm:$0xff]  }
  0x6d   : > { %771 = vmatpush1.bf16.msra.mxu0 %v2095_v5  ;;  %1999 = vmatpush1.bf16.msra.mxu1 %v2095_v5  ;;  %v2163_v54 = vld [vmem:[%s2534_s6 + $0x194] ss:$8 sps:$4 sm:$0xff]   ;;  %v2165_v55 = vld [vmem:[%s2534_s6 + $0x90] ss:$8 sps:$4 sm:$0xff]   ;;  %v2167_v57 = vld [vmem:[%s2534_s6 + $0xa4] ss:$8 sps:$4 sm:$0xff]  }
  0x6e   : > { %772 = vmatprep.subr.bf16.mxu0 %v2355_v0  ;;  %1984 = vmatprep.subr.bf16.mxu1 %v2355_v0  ;;  %v2166_v56 = vld [vmem:[%s2534_s6 + $0x190] ss:$8 sps:$4 sm:$0xff]   ;;  %v2169_v58 = vld [vmem:[%s2534_s6 + $0x1a4] ss:$8 sps:$4 sm:$0xff]   ;;  %v2171_v59 = vld [vmem:[%s2534_s6 + $0xa0] ss:$8 sps:$4 sm:$0xff]  }
  0x6f   : > { %v2172_v60 = vld [vmem:[%s2534_s6 + $0x1a0] ss:$8 sps:$4 sm:$0xff]   ;;  %v2173_v61 = vld [vmem:[%s2534_s6 + $0xb4] ss:$8 sps:$4 sm:$0xff]   ;;  %v2177_v63 = vld [vmem:[%s2534_s6 + $0xb0] ss:$8 sps:$4 sm:$0xff]  }
  0x70   : > { %v2175_v62 = vld [vmem:[%s2534_s6 + $0x1b4] ss:$8 sps:$4 sm:$0xff]   ;;  %v2179_v1 = vld [vmem:[%s2534_s6 + $0xc4] ss:$8 sps:$4 sm:$0xff]   ;;  %v2183_v3 = vld [vmem:[%s2534_s6 + $0xc0] ss:$8 sps:$4 sm:$0xff]  }
  0x71   : > { %773 = vmatpush1.bf16.msra.mxu0 %v2096_v7  ;;  %2000 = vmatpush1.bf16.msra.mxu1 %v2096_v7  ;;  %v2181_v2 = vld [vmem:[%s2534_s6 + $0x1c4] ss:$8 sps:$4 sm:$0xff]   ;;  %v2184_v4 = vld [vmem:[%s2534_s6 + $0x1c0] ss:$8 sps:$4 sm:$0xff]   ;;  %v2185_v5 = vld [vmem:[%s2534_s6 + $0xd4] ss:$8 sps:$4 sm:$0xff]  }
  0x72   : > { %774 = vmatprep.subr.bf16.mxu0 %v2355_v0  ;;  %1985 = vmatprep.subr.bf16.mxu1 %v2355_v0  ;;  %v2187_v6 = vld [vmem:[%s2534_s6 + $0x1d4] ss:$8 sps:$4 sm:$0xff]   ;;  %v2189_v7 = vld [vmem:[%s2534_s6 + $0xd0] ss:$8 sps:$4 sm:$0xff]  }
  0x73   : > { %v2190_v8 = vld [vmem:[%s2534_s6 + $0x1d0] ss:$8 sps:$4 sm:$0xff]  }
  0x75   : > { %775 = vmatpush1.bf16.msra.mxu0 %v2097_v9  ;;  %2001 = vmatpush1.bf16.msra.mxu1 %v2097_v9  ;;  %v2191_v9 = vld [vmem:[%s2534_s6 + $0xe4] ss:$8 sps:$4 sm:$0xff]  }
  0x76   : > { %776 = vmatprep.subr.bf16.mxu0 %v2355_v0  ;;  %1986 = vmatprep.subr.bf16.mxu1 %v2355_v0 }
  0x79   : > { %777 = vmatpush1.bf16.msra.mxu0 %v2098_v10  ;;  %2002 = vmatpush1.bf16.msra.mxu1 %v2098_v10  ;;  %v2193_v10 = vld [vmem:[%s2534_s6 + $0x1e4] ss:$8 sps:$4 sm:$0xff]  }
  0x7a   : > { %778 = vmatprep.subr.bf16.mxu0 %v2355_v0  ;;  %1987 = vmatprep.subr.bf16.mxu1 %v2355_v0 }
  0x7d   : > { %779 = vmatpush1.bf16.msra.mxu0 %v2099_v11  ;;  %2003 = vmatpush1.bf16.msra.mxu1 %v2099_v11  ;;  %v2195_v11 = vld [vmem:[%s2534_s6 + $0xe0] ss:$8 sps:$4 sm:$0xff]  }
  0x7e   : > { %780 = vmatprep.subr.bf16.mxu0 %v2355_v0  ;;  %1988 = vmatprep.subr.bf16.mxu1 %v2355_v0 }
  0x81   : > { %781 = vmatpush1.bf16.msra.mxu0 %v2100_v12  ;;  %2004 = vmatpush1.bf16.msra.mxu1 %v2100_v12  ;;  %v2196_v12 = vld [vmem:[%s2534_s6 + $0x1e0] ss:$8 sps:$4 sm:$0xff]  }
  0x82   : > { %782 = vmatprep.subr.bf16.mxu0 %v2355_v0  ;;  %1989 = vmatprep.subr.bf16.mxu1 %v2355_v0 }
  0x85   : > { %783 = vmatpush1.bf16.msra.mxu0 %v2101_v13  ;;  %2005 = vmatpush1.bf16.msra.mxu1 %v2101_v13  ;;  %v2197_v13 = vld [vmem:[%s2534_s6 + $0xf4] ss:$8 sps:$4 sm:$0xff]  }
  0x86   : > { %784 = vmatprep.subr.bf16.mxu0 %v2355_v0  ;;  %1990 = vmatprep.subr.bf16.mxu1 %v2355_v0 }
  0x89   : > { %785 = vmatpush1.bf16.msra.mxu0 %v2102_v14  ;;  %2006 = vmatpush1.bf16.msra.mxu1 %v2102_v14  ;;  %v2199_v14 = vld [vmem:[%s2534_s6 + $0x1f4] ss:$8 sps:$4 sm:$0xff]  }
  0x8a   : > { %786 = vmatprep.subr.bf16.mxu0 %v2355_v0  ;;  %1991 = vmatprep.subr.bf16.mxu1 %v2355_v0 }
  0x8d   : > { %787 = vmatpush1.bf16.msra.mxu0 %v2103_v15  ;;  %2007 = vmatpush1.bf16.msra.mxu1 %v2103_v15  ;;  %v2201_v15 = vld [vmem:[%s2534_s6 + $0xf0] ss:$8 sps:$4 sm:$0xff]  }
  0x8e   : > { %788 = vmatprep.subr.bf16.mxu0 %v2355_v0  ;;  %1992 = vmatprep.subr.bf16.mxu1 %v2355_v0 }
  0x91   : > { %789 = vmatpush1.bf16.msra.mxu0 %v2104_v16  ;;  %2008 = vmatpush1.bf16.msra.mxu1 %v2104_v16  ;;  %v2202_v16 = vld [vmem:[%s2534_s6 + $0x1f0] ss:$8 sps:$4 sm:$0xff]  }
  0x92   : > { %790 = vmatprep.subr.bf16.mxu0 %v2355_v0  ;;  %1993 = vmatprep.subr.bf16.mxu1 %v2355_v0 }
  0x95   : > { %791 = vmatpush1.bf16.msra.mxu0 %v2105_v17  ;;  %2009 = vmatpush1.bf16.msra.mxu1 %v2105_v17  ;;  %v2643_v17 = vld [vmem:[%s2801_s2] ss:$0 sm:$0xff] }
  0x96   : > { %792 = vmatprep.subr.bf16.mxu0 %v2355_v0  ;;  %1994 = vmatprep.subr.bf16.mxu1 %v2355_v0  ;;  %v2178_v0 = vld [vmem:[%s2534_s6 + $0x1b0] ss:$8 sps:$4 sm:$0xff]  }
  0x99   : > { %793 = vmatpush1.bf16.msra.mxu0 %v2106_v18  ;;  %2010 = vmatpush1.bf16.msra.mxu1 %v2106_v18 }
  0x9c   : > { %795 = vmatmul.mubr.bf16.vlgmr.msra.gmra.mrb[0].mxu0 %v2107_v19  ;;  %923 = vmatmul.mubr.bf16.vlgmr.msra.gmra.mrb[0].mxu1 %v2110_v20 }
  0x9d   : > { %802 = vmatprep.mubr.bf16.mxu0 %v2113_v21  ;;  %930 = vmatprep.mubr.bf16.mxu1 %v2115_v22 }
  0xa4   : > { %803 = vmatmul.mubr.bf16.gmra.mrb[4].mxu0 %v2117_v23  ;;  %931 = vmatmul.mubr.bf16.gmra.mrb[4].mxu1 %v2118_v24 }
  0xa5   : > { %810 = vmatprep.mubr.bf16.mxu0 %v2119_v25  ;;  %938 = vmatprep.mubr.bf16.mxu1 %v2121_v26 }
  0xac   : > { %811 = vmatmul.mubr.bf16.gmra.mrb[8].mxu0 %v2123_v27  ;;  %939 = vmatmul.mubr.bf16.gmra.mrb[8].mxu1 %v2124_v28 }
  0xad   : > { %818 = vmatprep.mubr.bf16.mxu0 %v2125_v29  ;;  %946 = vmatprep.mubr.bf16.mxu1 %v2127_v30 }
  0xb4   : > { %819 = vmatmul.mubr.bf16.gmra.mrb[12].mxu0 %v2129_v31  ;;  %947 = vmatmul.mubr.bf16.gmra.mrb[12].mxu1 %v2130_v32 }
  0xb5   : > { %826 = vmatprep.mubr.bf16.mxu0 %v2131_v33  ;;  %954 = vmatprep.mubr.bf16.mxu1 %v2133_v34 }
  0xbc   : > { %827 = vmatmul.mubr.bf16.gmra.mrb[16].mxu0 %v2135_v35  ;;  %955 = vmatmul.mubr.bf16.gmra.mrb[16].mxu1 %v2136_v36 }
  0xbd   : > { %834 = vmatprep.mubr.bf16.mxu0 %v2137_v37  ;;  %962 = vmatprep.mubr.bf16.mxu1 %v2139_v38 }
  0xc4   : > { %835 = vmatmul.mubr.bf16.gmra.mrb[20].mxu0 %v2141_v39  ;;  %963 = vmatmul.mubr.bf16.gmra.mrb[20].mxu1 %v2142_v40 }
  0xc5   : > { %842 = vmatprep.mubr.bf16.mxu0 %v2143_v41  ;;  %970 = vmatprep.mubr.bf16.mxu1 %v2145_v42 }
  0xcc   : > { %843 = vmatmul.mubr.bf16.gmra.mrb[24].mxu0 %v2147_v43  ;;  %971 = vmatmul.mubr.bf16.gmra.mrb[24].mxu1 %v2148_v44 }
  0xcd   : > { %850 = vmatprep.mubr.bf16.mxu0 %v2149_v45  ;;  %978 = vmatprep.mubr.bf16.mxu1 %v2151_v46 }
  0xd4   : > { %851 = vmatmul.mubr.bf16.gmra.mrb[28].mxu0 %v2153_v47  ;;  %979 = vmatmul.mubr.bf16.gmra.mrb[28].mxu1 %v2154_v48 }
  0xd5   : > { %858 = vmatprep.mubr.bf16.mxu0 %v2155_v49  ;;  %986 = vmatprep.mubr.bf16.mxu1 %v2157_v50 }
  0xdc   : > { %859 = vmatmul.mubr.bf16.gmra.mrb[32].mxu0 %v2159_v51  ;;  %987 = vmatmul.mubr.bf16.gmra.mrb[32].mxu1 %v2160_v52 }
  0xdd   : > { %866 = vmatprep.mubr.bf16.mxu0 %v2161_v53  ;;  %994 = vmatprep.mubr.bf16.mxu1 %v2163_v54 }
  0xe4   : > { %867 = vmatmul.mubr.bf16.gmra.mrb[36].mxu0 %v2165_v55  ;;  %995 = vmatmul.mubr.bf16.gmra.mrb[36].mxu1 %v2166_v56 }
  0xe5   : > { %874 = vmatprep.mubr.bf16.mxu0 %v2167_v57  ;;  %1002 = vmatprep.mubr.bf16.mxu1 %v2169_v58 }
  0xec   : > { %875 = vmatmul.mubr.bf16.gmra.mrb[40].mxu0 %v2171_v59  ;;  %1003 = vmatmul.mubr.bf16.gmra.mrb[40].mxu1 %v2172_v60 }
  0xed   : > { %882 = vmatprep.mubr.bf16.mxu0 %v2173_v61  ;;  %1010 = vmatprep.mubr.bf16.mxu1 %v2175_v62 }
  0xf4   : > { %883 = vmatmul.mubr.bf16.gmra.mrb[44].mxu0 %v2177_v63  ;;  %1011 = vmatmul.mubr.bf16.gmra.mrb[44].mxu1 %v2178_v0 }
  0xf5   : > { %890 = vmatprep.mubr.bf16.mxu0 %v2179_v1  ;;  %1018 = vmatprep.mubr.bf16.mxu1 %v2181_v2 }
  0xfc   : > { %891 = vmatmul.mubr.bf16.gmra.mrb[48].mxu0 %v2183_v3  ;;  %1019 = vmatmul.mubr.bf16.gmra.mrb[48].mxu1 %v2184_v4 }
  0xfd   : > { %898 = vmatprep.mubr.bf16.mxu0 %v2185_v5  ;;  %1026 = vmatprep.mubr.bf16.mxu1 %v2187_v6 }
 0x104   : > { %899 = vmatmul.mubr.bf16.gmra.mrb[52].mxu0 %v2189_v7  ;;  %1027 = vmatmul.mubr.bf16.gmra.mrb[52].mxu1 %v2190_v8 }
 0x105   : > { %906 = vmatprep.mubr.bf16.mxu0 %v2191_v9  ;;  %1034 = vmatprep.mubr.bf16.mxu1 %v2193_v10 }
 0x10c   : > { %907 = vmatmul.mubr.bf16.gmra.mrb[56].mxu0 %v2195_v11  ;;  %1035 = vmatmul.mubr.bf16.gmra.mrb[56].mxu1 %v2196_v12 }
 0x10d   : > { %914 = vmatprep.mubr.bf16.mxu0 %v2197_v13  ;;  %1042 = vmatprep.mubr.bf16.mxu1 %v2199_v14 }
 0x114   : > { %915 = vmatmul.mubr.bf16.gmra.mrb[60].mxu0 %v2201_v15  ;;  %1043 = vmatmul.mubr.bf16.gmra.mrb[60].mxu1 %v2202_v16 }
 0x16f   : > { %v796_v18 = vpop.f32.mrb[0].mxu0  ;;  %v924_v19 = vpop.f32.mrb[0].mxu1 }
 0x170   : > { %v797_v20 = vadd.f32 %v2643_v17, %v796_v18  ;;  %v925_v21 = vadd.f32 %v2643_v17, %v924_v19  ;;  %v798_v22 = vpop.f32.mrb[1].mxu0  ;;  %v926_v23 = vpop.f32.mrb[1].mxu1 }
 0x171   : > { %v799_v24 = vpop.f32.mrb[2].mxu0  ;;  %v927_v25 = vpop.f32.mrb[2].mxu1 }
 0x172   : > { %v800_v26 = vadd.f32 %v2643_v17, %v799_v24  ;;  %v928_v27 = vadd.f32 %v2643_v17, %v927_v25  ;;  %v801_v28 = vpop.f32.mrb[3].mxu0  ;;  %v929_v29 = vpop.f32.mrb[3].mxu1  ;;  %v1051_v30 = vmax.f32 %v797_v20, 0.0  ;;  %v1083_v31 = vmax.f32 %v925_v21, 0.0 }
 0x174   : > { %v1052_v32 = vmax.f32 %v800_v26, 0.0  ;;  %v1084_v33 = vmax.f32 %v928_v27, 0.0 }
 0x176   : > { %v1791_v34 = vpack.c.bf16 %v1052_v32, %v1051_v30  ;;  %v1871_v35 = vpack.c.bf16 %v1084_v33, %v1083_v31 }
 0x177   : > { %v804_v36 = vpop.f32.mrb[4].mxu0  ;;  %v932_v37 = vpop.f32.mrb[4].mxu1 }
 0x178   : > { %1792 = vst [vmem:[%s2650_s9] sm:$0xff] %v1791_v34   ;;  %1963 = vst [vmem:[%s2650_s9 + $0x80] sm:$0xff] %v1871_v35   ;;  %v805_v38 = vadd.f32 %v2643_v17, %v804_v36  ;;  %v933_v39 = vadd.f32 %v2643_v17, %v932_v37  ;;  %v806_v40 = vpop.f32.mrb[5].mxu0  ;;  %v934_v41 = vpop.f32.mrb[5].mxu1 }
 0x179   : > { %v807_v42 = vpop.f32.mrb[6].mxu0  ;;  %v935_v43 = vpop.f32.mrb[6].mxu1 }
 0x17a   : > { %v808_v44 = vadd.f32 %v2643_v17, %v807_v42  ;;  %v936_v45 = vadd.f32 %v2643_v17, %v935_v43  ;;  %v809_v46 = vpop.f32.mrb[7].mxu0  ;;  %v937_v47 = vpop.f32.mrb[7].mxu1  ;;  %v1053_v48 = vmax.f32 %v805_v38, 0.0  ;;  %v1085_v49 = vmax.f32 %v933_v39, 0.0 }
 0x17c   : > { %v1054_v50 = vmax.f32 %v808_v44, 0.0  ;;  %v1086_v51 = vmax.f32 %v936_v45, 0.0 }
 0x17e   : > { %v1796_v52 = vpack.c.bf16 %v1054_v50, %v1053_v48  ;;  %v1876_v53 = vpack.c.bf16 %v1086_v51, %v1085_v49 }
 0x17f   : > { %v812_v54 = vpop.f32.mrb[8].mxu0  ;;  %v940_v55 = vpop.f32.mrb[8].mxu1 }
 0x180   : > { %1948 = vst [vmem:[%s2650_s9 + $0x8] sm:$0xff] %v1796_v52   ;;  %1964 = vst [vmem:[%s2650_s9 + $0x88] sm:$0xff] %v1876_v53   ;;  %v813_v56 = vadd.f32 %v2643_v17, %v812_v54  ;;  %v941_v57 = vadd.f32 %v2643_v17, %v940_v55  ;;  %v814_v58 = vpop.f32.mrb[9].mxu0  ;;  %v942_v59 = vpop.f32.mrb[9].mxu1 }
 0x181   : > { %v815_v60 = vpop.f32.mrb[10].mxu0  ;;  %v943_v61 = vpop.f32.mrb[10].mxu1 }
 0x182   : > { %v816_v62 = vadd.f32 %v2643_v17, %v815_v60  ;;  %v944_v63 = vadd.f32 %v2643_v17, %v943_v61  ;;  %v817_v0 = vpop.f32.mrb[11].mxu0  ;;  %v945_v1 = vpop.f32.mrb[11].mxu1  ;;  %v1055_v2 = vmax.f32 %v813_v56, 0.0  ;;  %v1087_v3 = vmax.f32 %v941_v57, 0.0 }
 0x184   : > { %v1056_v4 = vmax.f32 %v816_v62, 0.0  ;;  %v1088_v5 = vmax.f32 %v944_v63, 0.0 }
 0x186   : > { %v1801_v6 = vpack.c.bf16 %v1056_v4, %v1055_v2  ;;  %v1881_v7 = vpack.c.bf16 %v1088_v5, %v1087_v3 }
 0x187   : > { %v820_v8 = vpop.f32.mrb[12].mxu0  ;;  %v948_v9 = vpop.f32.mrb[12].mxu1 }
 0x188   : > { %1949 = vst [vmem:[%s2650_s9 + $0x10] sm:$0xff] %v1801_v6   ;;  %1965 = vst [vmem:[%s2650_s9 + $0x90] sm:$0xff] %v1881_v7   ;;  %v821_v10 = vadd.f32 %v2643_v17, %v820_v8  ;;  %v949_v11 = vadd.f32 %v2643_v17, %v948_v9  ;;  %v822_v12 = vpop.f32.mrb[13].mxu0  ;;  %v950_v13 = vpop.f32.mrb[13].mxu1 }
 0x189   : > { %v823_v14 = vpop.f32.mrb[14].mxu0  ;;  %v951_v15 = vpop.f32.mrb[14].mxu1 }
 0x18a   : > { %v824_v16 = vadd.f32 %v2643_v17, %v823_v14  ;;  %v952_v18 = vadd.f32 %v2643_v17, %v951_v15  ;;  %v825_v19 = vpop.f32.mrb[15].mxu0  ;;  %v953_v20 = vpop.f32.mrb[15].mxu1  ;;  %v1057_v21 = vmax.f32 %v821_v10, 0.0  ;;  %v1089_v22 = vmax.f32 %v949_v11, 0.0 }
 0x18c   : > { %v1058_v23 = vmax.f32 %v824_v16, 0.0  ;;  %v1090_v24 = vmax.f32 %v952_v18, 0.0 }
 0x18e   : > { %v1806_v25 = vpack.c.bf16 %v1058_v23, %v1057_v21  ;;  %v1886_v26 = vpack.c.bf16 %v1090_v24, %v1089_v22 }
 0x18f   : > { %v828_v27 = vpop.f32.mrb[16].mxu0  ;;  %v956_v28 = vpop.f32.mrb[16].mxu1 }
 0x190   : > { %1950 = vst [vmem:[%s2650_s9 + $0x18] sm:$0xff] %v1806_v25   ;;  %1966 = vst [vmem:[%s2650_s9 + $0x98] sm:$0xff] %v1886_v26   ;;  %v829_v29 = vadd.f32 %v2643_v17, %v828_v27  ;;  %v957_v30 = vadd.f32 %v2643_v17, %v956_v28  ;;  %v830_v31 = vpop.f32.mrb[17].mxu0  ;;  %v958_v32 = vpop.f32.mrb[17].mxu1 }
 0x191   : > { %v831_v33 = vpop.f32.mrb[18].mxu0  ;;  %v959_v34 = vpop.f32.mrb[18].mxu1 }
 0x192   : > { %v832_v35 = vadd.f32 %v2643_v17, %v831_v33  ;;  %v960_v36 = vadd.f32 %v2643_v17, %v959_v34  ;;  %v833_v37 = vpop.f32.mrb[19].mxu0  ;;  %v961_v38 = vpop.f32.mrb[19].mxu1  ;;  %v1059_v39 = vmax.f32 %v829_v29, 0.0  ;;  %v1091_v40 = vmax.f32 %v957_v30, 0.0 }
 0x194   : > { %v1060_v41 = vmax.f32 %v832_v35, 0.0  ;;  %v1092_v42 = vmax.f32 %v960_v36, 0.0 }
 0x196   : > { %v1811_v43 = vpack.c.bf16 %v1060_v41, %v1059_v39  ;;  %v1891_v44 = vpack.c.bf16 %v1092_v42, %v1091_v40 }
 0x197   : > { %v836_v45 = vpop.f32.mrb[20].mxu0  ;;  %v964_v46 = vpop.f32.mrb[20].mxu1 }
 0x198   : > { %1951 = vst [vmem:[%s2650_s9 + $0x20] sm:$0xff] %v1811_v43   ;;  %1967 = vst [vmem:[%s2650_s9 + $0xa0] sm:$0xff] %v1891_v44   ;;  %v837_v47 = vadd.f32 %v2643_v17, %v836_v45  ;;  %v965_v48 = vadd.f32 %v2643_v17, %v964_v46  ;;  %v838_v49 = vpop.f32.mrb[21].mxu0  ;;  %v966_v50 = vpop.f32.mrb[21].mxu1 }
 0x199   : > { %v839_v51 = vpop.f32.mrb[22].mxu0  ;;  %v967_v52 = vpop.f32.mrb[22].mxu1 }
 0x19a   : > { %v840_v53 = vadd.f32 %v2643_v17, %v839_v51  ;;  %v968_v54 = vadd.f32 %v2643_v17, %v967_v52  ;;  %v841_v55 = vpop.f32.mrb[23].mxu0  ;;  %v969_v56 = vpop.f32.mrb[23].mxu1  ;;  %v1061_v57 = vmax.f32 %v837_v47, 0.0  ;;  %v1093_v58 = vmax.f32 %v965_v48, 0.0 }
 0x19c   : > { %v1062_v59 = vmax.f32 %v840_v53, 0.0  ;;  %v1094_v60 = vmax.f32 %v968_v54, 0.0 }
 0x19e   : > { %v1816_v61 = vpack.c.bf16 %v1062_v59, %v1061_v57  ;;  %v1896_v62 = vpack.c.bf16 %v1094_v60, %v1093_v58 }
 0x19f   : > { %v844_v63 = vpop.f32.mrb[24].mxu0  ;;  %v972_v0 = vpop.f32.mrb[24].mxu1 }
 0x1a0   : > { %1952 = vst [vmem:[%s2650_s9 + $0x28] sm:$0xff] %v1816_v61   ;;  %1968 = vst [vmem:[%s2650_s9 + $0xa8] sm:$0xff] %v1896_v62   ;;  %v845_v1 = vadd.f32 %v2643_v17, %v844_v63  ;;  %v973_v2 = vadd.f32 %v2643_v17, %v972_v0  ;;  %v846_v3 = vpop.f32.mrb[25].mxu0  ;;  %v974_v4 = vpop.f32.mrb[25].mxu1 }
 0x1a1   : > { %v847_v5 = vpop.f32.mrb[26].mxu0  ;;  %v975_v6 = vpop.f32.mrb[26].mxu1 }
 0x1a2   : > { %v848_v7 = vadd.f32 %v2643_v17, %v847_v5  ;;  %v976_v8 = vadd.f32 %v2643_v17, %v975_v6  ;;  %v849_v9 = vpop.f32.mrb[27].mxu0  ;;  %v977_v10 = vpop.f32.mrb[27].mxu1  ;;  %v1063_v11 = vmax.f32 %v845_v1, 0.0  ;;  %v1095_v12 = vmax.f32 %v973_v2, 0.0 }
 0x1a4   : > { %v1064_v13 = vmax.f32 %v848_v7, 0.0  ;;  %v1096_v14 = vmax.f32 %v976_v8, 0.0 }
 0x1a6   : > { %v1821_v15 = vpack.c.bf16 %v1064_v13, %v1063_v11  ;;  %v1901_v16 = vpack.c.bf16 %v1096_v14, %v1095_v12 }
 0x1a7   : > { %v852_v18 = vpop.f32.mrb[28].mxu0  ;;  %v980_v19 = vpop.f32.mrb[28].mxu1 }
 0x1a8   : > { %1953 = vst [vmem:[%s2650_s9 + $0x30] sm:$0xff] %v1821_v15   ;;  %1969 = vst [vmem:[%s2650_s9 + $0xb0] sm:$0xff] %v1901_v16   ;;  %v853_v20 = vadd.f32 %v2643_v17, %v852_v18  ;;  %v981_v21 = vadd.f32 %v2643_v17, %v980_v19  ;;  %v854_v22 = vpop.f32.mrb[29].mxu0  ;;  %v982_v23 = vpop.f32.mrb[29].mxu1 }
 0x1a9   : > { %v855_v24 = vpop.f32.mrb[30].mxu0  ;;  %v983_v25 = vpop.f32.mrb[30].mxu1 }
 0x1aa   : > { %v856_v26 = vadd.f32 %v2643_v17, %v855_v24  ;;  %v984_v27 = vadd.f32 %v2643_v17, %v983_v25  ;;  %v857_v28 = vpop.f32.mrb[31].mxu0  ;;  %v985_v29 = vpop.f32.mrb[31].mxu1  ;;  %v1065_v30 = vmax.f32 %v853_v20, 0.0  ;;  %v1097_v31 = vmax.f32 %v981_v21, 0.0 }
 0x1ac   : > { %v1066_v32 = vmax.f32 %v856_v26, 0.0  ;;  %v1098_v33 = vmax.f32 %v984_v27, 0.0 }
 0x1ae   : > { %v1826_v34 = vpack.c.bf16 %v1066_v32, %v1065_v30  ;;  %v1906_v35 = vpack.c.bf16 %v1098_v33, %v1097_v31 }
 0x1af   : > { %v860_v36 = vpop.f32.mrb[32].mxu0  ;;  %v988_v37 = vpop.f32.mrb[32].mxu1 }
 0x1b0   : > { %1954 = vst [vmem:[%s2650_s9 + $0x38] sm:$0xff] %v1826_v34   ;;  %1970 = vst [vmem:[%s2650_s9 + $0xb8] sm:$0xff] %v1906_v35   ;;  %v861_v38 = vadd.f32 %v2643_v17, %v860_v36  ;;  %v989_v39 = vadd.f32 %v2643_v17, %v988_v37  ;;  %v862_v40 = vpop.f32.mrb[33].mxu0  ;;  %v990_v41 = vpop.f32.mrb[33].mxu1 }
 0x1b1   : > { %v863_v42 = vpop.f32.mrb[34].mxu0  ;;  %v991_v43 = vpop.f32.mrb[34].mxu1 }
 0x1b2   : > { %v864_v44 = vadd.f32 %v2643_v17, %v863_v42  ;;  %v992_v45 = vadd.f32 %v2643_v17, %v991_v43  ;;  %v865_v46 = vpop.f32.mrb[35].mxu0  ;;  %v993_v47 = vpop.f32.mrb[35].mxu1  ;;  %v1067_v48 = vmax.f32 %v861_v38, 0.0  ;;  %v1099_v49 = vmax.f32 %v989_v39, 0.0 }
 0x1b4   : > { %v1068_v50 = vmax.f32 %v864_v44, 0.0  ;;  %v1100_v51 = vmax.f32 %v992_v45, 0.0 }
 0x1b6   : > { %v1831_v52 = vpack.c.bf16 %v1068_v50, %v1067_v48  ;;  %v1911_v53 = vpack.c.bf16 %v1100_v51, %v1099_v49 }
 0x1b7   : > { %v868_v54 = vpop.f32.mrb[36].mxu0  ;;  %v996_v55 = vpop.f32.mrb[36].mxu1 }
 0x1b8   : > { %1955 = vst [vmem:[%s2650_s9 + $0x40] sm:$0xff] %v1831_v52   ;;  %1971 = vst [vmem:[%s2650_s9 + $0xc0] sm:$0xff] %v1911_v53   ;;  %v869_v56 = vadd.f32 %v2643_v17, %v868_v54  ;;  %v997_v57 = vadd.f32 %v2643_v17, %v996_v55  ;;  %v870_v58 = vpop.f32.mrb[37].mxu0  ;;  %v998_v59 = vpop.f32.mrb[37].mxu1 }
 0x1b9   : > { %v871_v60 = vpop.f32.mrb[38].mxu0  ;;  %v999_v61 = vpop.f32.mrb[38].mxu1 }
 0x1ba   : > { %v872_v62 = vadd.f32 %v2643_v17, %v871_v60  ;;  %v1000_v63 = vadd.f32 %v2643_v17, %v999_v61  ;;  %v873_v0 = vpop.f32.mrb[39].mxu0  ;;  %v1001_v1 = vpop.f32.mrb[39].mxu1  ;;  %v1069_v2 = vmax.f32 %v869_v56, 0.0  ;;  %v1101_v3 = vmax.f32 %v997_v57, 0.0 }
 0x1bc   : > { %v1070_v4 = vmax.f32 %v872_v62, 0.0  ;;  %v1102_v5 = vmax.f32 %v1000_v63, 0.0 }
 0x1be   : > { %v1836_v6 = vpack.c.bf16 %v1070_v4, %v1069_v2  ;;  %v1916_v7 = vpack.c.bf16 %v1102_v5, %v1101_v3 }
 0x1bf   : > { %v876_v8 = vpop.f32.mrb[40].mxu0  ;;  %v1004_v9 = vpop.f32.mrb[40].mxu1 }
 0x1c0   : > { %1956 = vst [vmem:[%s2650_s9 + $0x48] sm:$0xff] %v1836_v6   ;;  %1972 = vst [vmem:[%s2650_s9 + $0xc8] sm:$0xff] %v1916_v7   ;;  %v877_v10 = vadd.f32 %v2643_v17, %v876_v8  ;;  %v1005_v11 = vadd.f32 %v2643_v17, %v1004_v9  ;;  %v878_v12 = vpop.f32.mrb[41].mxu0  ;;  %v1006_v13 = vpop.f32.mrb[41].mxu1 }
 0x1c1   : > { %v879_v14 = vpop.f32.mrb[42].mxu0  ;;  %v1007_v15 = vpop.f32.mrb[42].mxu1 }
 0x1c2   : > { %v880_v16 = vadd.f32 %v2643_v17, %v879_v14  ;;  %v1008_v18 = vadd.f32 %v2643_v17, %v1007_v15  ;;  %v881_v19 = vpop.f32.mrb[43].mxu0  ;;  %v1009_v20 = vpop.f32.mrb[43].mxu1  ;;  %v1071_v21 = vmax.f32 %v877_v10, 0.0  ;;  %v1103_v22 = vmax.f32 %v1005_v11, 0.0 }
 0x1c4   : > { %v1072_v23 = vmax.f32 %v880_v16, 0.0  ;;  %v1104_v24 = vmax.f32 %v1008_v18, 0.0 }
 0x1c6   : > { %v1841_v25 = vpack.c.bf16 %v1072_v23, %v1071_v21  ;;  %v1921_v26 = vpack.c.bf16 %v1104_v24, %v1103_v22 }
 0x1c7   : > { %v884_v27 = vpop.f32.mrb[44].mxu0  ;;  %v1012_v28 = vpop.f32.mrb[44].mxu1 }
 0x1c8   : > { %1957 = vst [vmem:[%s2650_s9 + $0x50] sm:$0xff] %v1841_v25   ;;  %1973 = vst [vmem:[%s2650_s9 + $0xd0] sm:$0xff] %v1921_v26   ;;  %v885_v29 = vadd.f32 %v2643_v17, %v884_v27  ;;  %v1013_v30 = vadd.f32 %v2643_v17, %v1012_v28  ;;  %v886_v31 = vpop.f32.mrb[45].mxu0  ;;  %v1014_v32 = vpop.f32.mrb[45].mxu1 }
 0x1c9   : > { %v887_v33 = vpop.f32.mrb[46].mxu0  ;;  %v1015_v34 = vpop.f32.mrb[46].mxu1 }
 0x1ca   : > { %v888_v35 = vadd.f32 %v2643_v17, %v887_v33  ;;  %v1016_v36 = vadd.f32 %v2643_v17, %v1015_v34  ;;  %v889_v37 = vpop.f32.mrb[47].mxu0  ;;  %v1017_v38 = vpop.f32.mrb[47].mxu1  ;;  %v1073_v39 = vmax.f32 %v885_v29, 0.0  ;;  %v1105_v40 = vmax.f32 %v1013_v30, 0.0 }
 0x1cc   : > { %v1074_v41 = vmax.f32 %v888_v35, 0.0  ;;  %v1106_v42 = vmax.f32 %v1016_v36, 0.0 }
 0x1ce   : > { %v1846_v43 = vpack.c.bf16 %v1074_v41, %v1073_v39  ;;  %v1926_v44 = vpack.c.bf16 %v1106_v42, %v1105_v40 }
 0x1cf   : > { %v892_v45 = vpop.f32.mrb[48].mxu0  ;;  %v1020_v46 = vpop.f32.mrb[48].mxu1 }
 0x1d0   : > { %1958 = vst [vmem:[%s2650_s9 + $0x58] sm:$0xff] %v1846_v43   ;;  %1974 = vst [vmem:[%s2650_s9 + $0xd8] sm:$0xff] %v1926_v44   ;;  %v893_v47 = vadd.f32 %v2643_v17, %v892_v45  ;;  %v1021_v48 = vadd.f32 %v2643_v17, %v1020_v46  ;;  %v894_v49 = vpop.f32.mrb[49].mxu0  ;;  %v1022_v50 = vpop.f32.mrb[49].mxu1 }
 0x1d1   : > { %v895_v51 = vpop.f32.mrb[50].mxu0  ;;  %v1023_v52 = vpop.f32.mrb[50].mxu1 }
 0x1d2   : > { %v896_v53 = vadd.f32 %v2643_v17, %v895_v51  ;;  %v1024_v54 = vadd.f32 %v2643_v17, %v1023_v52  ;;  %v897_v55 = vpop.f32.mrb[51].mxu0  ;;  %v1025_v56 = vpop.f32.mrb[51].mxu1  ;;  %v1075_v57 = vmax.f32 %v893_v47, 0.0  ;;  %v1107_v58 = vmax.f32 %v1021_v48, 0.0 }
 0x1d4   : > { %v1076_v59 = vmax.f32 %v896_v53, 0.0  ;;  %v1108_v60 = vmax.f32 %v1024_v54, 0.0 }
 0x1d6   : > { %v1851_v61 = vpack.c.bf16 %v1076_v59, %v1075_v57  ;;  %v1931_v62 = vpack.c.bf16 %v1108_v60, %v1107_v58 }
 0x1d7   : > { %v900_v63 = vpop.f32.mrb[52].mxu0  ;;  %v1028_v0 = vpop.f32.mrb[52].mxu1 }
 0x1d8   : > { %1959 = vst [vmem:[%s2650_s9 + $0x60] sm:$0xff] %v1851_v61   ;;  %1975 = vst [vmem:[%s2650_s9 + $0xe0] sm:$0xff] %v1931_v62   ;;  %v901_v1 = vadd.f32 %v2643_v17, %v900_v63  ;;  %v1029_v2 = vadd.f32 %v2643_v17, %v1028_v0  ;;  %v902_v3 = vpop.f32.mrb[53].mxu0  ;;  %v1030_v4 = vpop.f32.mrb[53].mxu1 }
 0x1d9   : > { %v903_v5 = vpop.f32.mrb[54].mxu0  ;;  %v1031_v6 = vpop.f32.mrb[54].mxu1 }
 0x1da   : > { %v904_v7 = vadd.f32 %v2643_v17, %v903_v5  ;;  %v1032_v8 = vadd.f32 %v2643_v17, %v1031_v6  ;;  %v905_v9 = vpop.f32.mrb[55].mxu0  ;;  %v1033_v10 = vpop.f32.mrb[55].mxu1  ;;  %v1077_v11 = vmax.f32 %v901_v1, 0.0  ;;  %v1109_v12 = vmax.f32 %v1029_v2, 0.0 }
 0x1dc   : > { %v1078_v13 = vmax.f32 %v904_v7, 0.0  ;;  %v1110_v14 = vmax.f32 %v1032_v8, 0.0 }
 0x1de   : > { %v1856_v15 = vpack.c.bf16 %v1078_v13, %v1077_v11  ;;  %v1936_v16 = vpack.c.bf16 %v1110_v14, %v1109_v12 }
 0x1df   : > { %v908_v18 = vpop.f32.mrb[56].mxu0  ;;  %v1036_v19 = vpop.f32.mrb[56].mxu1 }
 0x1e0   : > { %1960 = vst [vmem:[%s2650_s9 + $0x68] sm:$0xff] %v1856_v15   ;;  %1976 = vst [vmem:[%s2650_s9 + $0xe8] sm:$0xff] %v1936_v16   ;;  %v909_v20 = vadd.f32 %v2643_v17, %v908_v18  ;;  %v1037_v21 = vadd.f32 %v2643_v17, %v1036_v19  ;;  %v910_v22 = vpop.f32.mrb[57].mxu0  ;;  %v1038_v23 = vpop.f32.mrb[57].mxu1 }
 0x1e1   : > { %v911_v24 = vpop.f32.mrb[58].mxu0  ;;  %v1039_v25 = vpop.f32.mrb[58].mxu1 }
 0x1e2   : > { %v912_v26 = vadd.f32 %v2643_v17, %v911_v24  ;;  %v1040_v27 = vadd.f32 %v2643_v17, %v1039_v25  ;;  %v913_v28 = vpop.f32.mrb[59].mxu0  ;;  %v1041_v29 = vpop.f32.mrb[59].mxu1  ;;  %v1079_v30 = vmax.f32 %v909_v20, 0.0  ;;  %v1111_v31 = vmax.f32 %v1037_v21, 0.0 }
 0x1e4   : > { %v1080_v32 = vmax.f32 %v912_v26, 0.0  ;;  %v1112_v33 = vmax.f32 %v1040_v27, 0.0 }
 0x1e6   : > { %v1861_v34 = vpack.c.bf16 %v1080_v32, %v1079_v30  ;;  %v1941_v35 = vpack.c.bf16 %v1112_v33, %v1111_v31 }
 0x1e7   : > { %v916_v36 = vpop.f32.mrb[60].mxu0  ;;  %v1044_v37 = vpop.f32.mrb[60].mxu1 }
 0x1e8   : > { %1961 = vst [vmem:[%s2650_s9 + $0x70] sm:$0xff] %v1861_v34   ;;  %1977 = vst [vmem:[%s2650_s9 + $0xf0] sm:$0xff] %v1941_v35   ;;  %v917_v38 = vadd.f32 %v2643_v17, %v916_v36  ;;  %v1045_v39 = vadd.f32 %v2643_v17, %v1044_v37  ;;  %v918_v40 = vpop.f32.mrb[61].mxu0  ;;  %v1046_v41 = vpop.f32.mrb[61].mxu1 }
 0x1e9   : > { %v919_v42 = vpop.f32.mrb[62].mxu0  ;;  %v1047_v43 = vpop.f32.mrb[62].mxu1 }
 0x1ea   : > { %v920_v44 = vadd.f32 %v2643_v17, %v919_v42  ;;  %v1048_v45 = vadd.f32 %v2643_v17, %v1047_v43  ;;  %v921_v46 = vpop.f32.mrb[63].mxu0  ;;  %v1049_v47 = vpop.f32.mrb[63].mxu1  ;;  %v1081_v48 = vmax.f32 %v917_v38, 0.0  ;;  %v1113_v49 = vmax.f32 %v1045_v39, 0.0 }
 0x1ec   : > { %v1082_v50 = vmax.f32 %v920_v44, 0.0  ;;  %v1114_v51 = vmax.f32 %v1048_v45, 0.0 }
 0x1ee   : > { %v1866_v17 = vpack.c.bf16 %v1082_v50, %v1081_v48  ;;  %v1946_v52 = vpack.c.bf16 %v1114_v51, %v1113_v49 }
 0x1f0   : > { %1962 = vst [vmem:[%s2650_s9 + $0x78] sm:$0xff] %v1866_v17   ;;  %1978 = vst [vmem:[%s2650_s9 + $0xf8] sm:$0xff] %v1946_v52  }
 0x1f1   : > { %2274 = shalt.err (!%p2271_p5)
}
 0x1f2   : > { %s2275_s29 = scalar_lea.hbm %s2747_s7, 4096  ;;  %s2279_s20 = scalar_lea.hbm %s2802_s3, 16384 }
 0x1f3   : > { %p2276_p9 = scmp.ne.s32.totalorder %s2747_s7, %s2275_s29  ;;  %p2280_p3 = scmp.lt.u32.totalorder %s2747_s7, %s2802_s3 }
 0x1f4   : > { %p2281_p7 = scmp.lt.u32.totalorder %s2279_s20, %s2275_s29  ;;  %p2283_p4 = scmp.lt.u32.totalorder %s2275_s29, %s2747_s7 }
 0x1f5   : > { %p2277_p1 = pnand %p2276_p9, %p2474_p11 }
 0x1f6   : > { %p2282_p13 = por %p2281_p7, %p2280_p3 }
 0x1f7   : > { %p2278_p2 = pneg %p2277_p1 }
 0x1f8   : > { %p2284_p6 = por %p2283_p4, %p2282_p13 }
 0x1fa   : > { %p2285_p8 = pnand %p2284_p6, %p2278_p2 }
 0x1fc   : > { %2288 = shalt.err (!%p2285_p8)
}
 0x1fd   : > { %s2357_s9 = smov 64   ;;  %s2358_s10 = smov 4  }
 0x1fe   : > { %2017 = dma.vmem_to_hbm [thread:$0]  (%p2474_p11), %s2749_s11, 4096, %s2747_s7, %s1436_s15, %s2357_s9, %s2357_s9, %s2358_s10  }
 0x1ff PF: > { %p2034_p12 = scmp.ge.s32.totalorder %s2347_s17, 2  ;;  %s1465_s18 = sand.u32 1, %s2327_s12  }
 0x200   : > { %p2820_p10 = scmp.ne.s32.totalorder %s2810_s23, 0  ;;  %s1466_s26 = scalar_lea.sflag [#allocation4], %s1465_s18 }
 0x202   : > { %p2028_p0 = pnand %p2034_p12, %p2820_p10 }
 0x204   : > { %2322 = dma.done.wait (!%p2028_p0), %s1466_s26, 4096  }
 0x205   : > { %2324 = vsyncadd (!%p2028_p0), %s1466_s26, 4294963200  ;;  %s20_s17 = sadd.s32 1, %s2347_s17   ;;  %s2821_s12 = smov %s2331_s13 }
 0x206   : > { %p17_p5 = scmp.ge.s32.totalorder %s20_s17, 6   ;;  %s2822_s13 = smov %s2335_s14 }
 0x207   : > { %s2823_s14 = smov %s2483_s5  ;;  %s2824_s15 = smov %s2343_s16 }
 0x208   : > { %s2825_s16 = smov %s2827_s28  ;;  %19 = sbr.rel (!%p17_p5) target bundleno = 7 (0x7), region = 85 }
 0x20f   :  { %1471 = vsyncpa [#allocation3], 1 }
 0x210   :  { %1473 = vsyncpa [#allocation3 + $0x1], 1 }
 0x211   :  { %1474 = vsyncpa [#allocation6], 1 }
 0x212   :  { %1475 = vsyncpa [#allocation4], 1 }
 0x213   :  { %1477 = vsyncpa [#allocation4 + $0x1], 1 }

</bundles_post_ra>
